<compile_context>
chip_gen: v7x
topology: tpu7x:2x2x1
jax: 0.10.0
libtpu: 0.0.40
codegen_flags: <defaults>
</compile_context>

<pallas_src>
import functools
import math

import jax
import jax.numpy as jnp
from jax.experimental import pallas as pl
from jax.experimental.pallas import tpu as pltpu


def _round_up(x, m):
    return ((x + m - 1) // m) * m


def _layernorm_kernel(x_ref, a_ref, b_ref, o_ref, *, eps, n_features):
    # x_ref: (tm, F) tile of rows; F is the TRUE feature count (full-extent
    # block), so jnp reductions over axis=-1 are already correct — Mosaic masks
    # the padded lanes under the hood.
    # a_ref/b_ref: (1, F) f32 scale/shift, resident across grid steps.
    x = x_ref[...].astype(jnp.float32)

    n = jnp.float32(n_features)
    mean = jnp.sum(x, axis=-1, keepdims=True) / n          # (tm, 1)

    # Two-pass variance: numerically robust (no E[x^2]-E[x]^2 cancellation) and
    # free here — the tile is already in VMEM and the kernel is HBM-bound.
    diff = x - mean
    # torch.std default: unbiased estimator (divisor N-1).
    # NOTE: n_features == 1 yields NaN, matching torch's behavior.
    var = jnp.sum(diff * diff, axis=-1, keepdims=True) / jnp.float32(n_features - 1)
    std = jnp.sqrt(var)

    # eps is added to std (not var), exactly as in the PyTorch module.
    denom = std + jnp.float32(eps)                 # (tm, 1)
    inv = pl.reciprocal(denom, approx=True)        # EUP slot, per-row only
    inv = inv * (2.0 - denom * inv)                # one Newton step -> ~f32-exact

    a = a_ref[...]                                 # (1, F) f32
    b = b_ref[...]
    y = (diff * inv) * a + b                       # mul, mul, add (no divide)
    o_ref[...] = y.astype(o_ref.dtype)


def layer_norm(x, a_2, b_2, eps=1e-6, *,
               tile_vmem_bytes=16 * 1024 * 1024,
               vmem_limit_bytes=48 * 1024 * 1024):
    """x: (..., features); a_2, b_2: (features,)."""
    orig_shape = x.shape
    features = orig_shape[-1]
    rows = math.prod(orig_shape[:-1]) if len(orig_shape) > 1 else 1
    x2d = x.reshape(rows, features)

    # Scale/shift as resident (1, F) f32 blocks. No feature padding: the kernel
    # uses a full-extent feature block, so no extra HBM pad/slice passes.
    a2d = a_2.astype(jnp.float32).reshape(1, features)
    b2d = b_2.astype(jnp.float32).reshape(1, features)

    itemsize = jnp.dtype(x.dtype).itemsize
    pack = max(8, 32 // itemsize)          # sublane packing: 8 (f32), 16 (bf16), 32 (int8)

    # Per-row VMEM: double-buffered input + output tiles (2 * 2 * F * itemsize)
    # PLUS ~3 f32 intermediates materialized in the kernel (x/diff, diff^2 term,
    # pre-cast y) at F * 4 B each. Under-counting these risks spills / OOM on
    # v7x's 64 MiB VMEM, especially for bf16 inputs.
    bytes_per_row = 4 * features * itemsize + 3 * features * 4
    tm = max(pack, tile_vmem_bytes // bytes_per_row)
    tm = min(tm, 4096)                     # plenty to amortize ~0.35us/step overhead
    if rows <= pack:
        tm = rows                          # full-extent second-last dim is legal
    else:
        tm = min(tm, _round_up(rows, pack))
        tm = max(pack, (tm // pack) * pack)

    grid = (pl.cdiv(rows, tm),)            # ragged last block is masked by Pallas

    kernel = functools.partial(_layernorm_kernel, eps=eps, n_features=features)

    out2d = pl.pallas_call(
        kernel,
        out_shape=jax.ShapeDtypeStruct((rows, features), x.dtype),
        grid_spec=pltpu.PrefetchScalarGridSpec(
            num_scalar_prefetch=0,
            grid=grid,
            in_specs=[
                pl.BlockSpec((tm, features), lambda i: (i, 0)),
                pl.BlockSpec((1, features), lambda i: (0, 0)),  # constant block -> resident
                pl.BlockSpec((1, features), lambda i: (0, 0)),
            ],
            out_specs=pl.BlockSpec((tm, features), lambda i: (i, 0)),
        ),
        compiler_params=pltpu.CompilerParams(
            # Row axis is embarrassingly parallel; shards across v7x's 2 TCs.
            dimension_semantics=("parallel",),
            vmem_limit_bytes=vmem_limit_bytes,
        ),
    )(x2d, a2d, b2d)

    return out2d.reshape(orig_shape)


def _reference(x, a_2, b_2, eps=1e-6):
    # Pure-JAX reference mirroring the PyTorch forward exactly (unbiased std).
    mean = jnp.mean(x, axis=-1, keepdims=True)
    var = jnp.sum((x - mean) ** 2, axis=-1, keepdims=True) / (x.shape[-1] - 1)
    std = jnp.sqrt(var)
    return a_2 * (x - mean) / (std + eps) + b_2


if __name__ == "__main__":
    key = jax.random.PRNGKey(0)
    k1, k2, k3, k4, k5 = jax.random.split(key, 5)

    # Case 1: module-default params (ones/zeros), narrow non-128 feature dim
    # (exercises the full-extent ragged-lane path — no wrapper pad/slice).
    batch, seq, features = 2, 8, 32
    x = jax.random.normal(k1, (batch, seq, features), dtype=jnp.float32)
    a_2 = jnp.ones((features,), dtype=jnp.float32)   # per module __init__
    b_2 = jnp.zeros((features,), dtype=jnp.float32)
    out = jax.block_until_ready(layer_norm(x, a_2, b_2, eps=1e-6))
    ref = _reference(x, a_2, b_2, eps=1e-6)
    assert out.shape == x.shape
    assert jnp.allclose(out, ref, atol=1e-4, rtol=1e-4), "case 1 mismatch vs reference"

    # Case 2: lane-dense features (multiple of 128), ragged row count,
    # non-trivial scale/shift (exercises cdiv masking + resident params).
    batch, seq, features = 2, 9, 256
    x = jax.random.normal(k2, (batch, seq, features), dtype=jnp.float32)
    a_2 = 1.0 + 0.1 * jax.random.normal(k3, (features,), dtype=jnp.float32)
    b_2 = 0.1 * jax.random.normal(k4, (features,), dtype=jnp.float32)
    out = jax.block_until_ready(layer_norm(x, a_2, b_2, eps=1e-6))
    ref = _reference(x, a_2, b_2, eps=1e-6)
    assert out.shape == x.shape
    assert jnp.allclose(out, ref, atol=1e-4, rtol=1e-4), "case 2 mismatch vs reference"

    # Case 3: large DC offset + non-128 feature dim — exercises the two-pass
    # variance (would lose precision with the E[x^2]-E[x]^2 form).
    batch, seq, features = 2, 7, 200
    x = 1000.0 + jax.random.normal(k5, (batch, seq, features), dtype=jnp.float32)
    a_2 = jnp.ones((features,), dtype=jnp.float32)
    b_2 = jnp.zeros((features,), dtype=jnp.float32)
    out = jax.block_until_ready(layer_norm(x, a_2, b_2, eps=1e-6))
    ref = _reference(x, a_2, b_2, eps=1e-6)
    assert out.shape == x.shape
    assert jnp.allclose(out, ref, atol=1e-3, rtol=1e-3), "case 3 mismatch vs reference"

    print("KERNEL_OK")
</pallas_src>

<mosaic_0001>
module attributes {stable_mosaic.version = 11 : i64} {
  func.func @_layernorm_kernel(%arg0: i32, %arg1: memref<16x32xf32, #tpu.memory_space<vmem>>, %arg2: memref<1x32xf32, #tpu.memory_space<vmem>>, %arg3: memref<1x32xf32, #tpu.memory_space<vmem>>, %arg4: memref<16x32xf32, #tpu.memory_space<vmem>>) attributes {dimension_semantics = [#tpu.dimension_semantics<parallel>], iteration_bounds = array<i64: 1>, scalar_prefetch = 0 : i64, scratch_operands = 0 : i64, tpu.core_type = #tpu.core_type<tc>, window_params = [{transform_indices = @transform_0, window_bounds = array<i64: 16, 32>}, {pipeline_mode = #tpu.pipeline_mode<synchronous>, transform_indices = @transform_1, window_bounds = array<i64: 1, 32>}, {pipeline_mode = #tpu.pipeline_mode<synchronous>, transform_indices = @transform_2, window_bounds = array<i64: 1, 32>}, {transform_indices = @transform_3, window_bounds = array<i64: 16, 32>}]} {
    %c0 = arith.constant 0 : index
    %c0_0 = arith.constant 0 : index
    %0 = vector.load %arg1[%c0, %c0_0] : memref<16x32xf32, #tpu.memory_space<vmem>>, vector<16x32xf32>
    %cst = arith.constant dense<0.000000e+00> : vector<16xf32>
    %1 = vector.multi_reduction <add>, %0, %cst [1] : vector<16x32xf32> to vector<16xf32>
    %2 = vector.shape_cast %1 : vector<16xf32> to vector<16x1xf32>
    %cst_1 = arith.constant 3.200000e+01 : f32
    %3 = vector.broadcast %cst_1 : f32 to vector<16x1xf32>
    %4 = arith.divf %2, %3 : vector<16x1xf32>
    %5 = vector.broadcast %4 : vector<16x1xf32> to vector<16x32xf32>
    %6 = arith.subf %0, %5 : vector<16x32xf32>
    %7 = arith.mulf %6, %6 : vector<16x32xf32>
    %cst_2 = arith.constant dense<0.000000e+00> : vector<16xf32>
    %8 = vector.multi_reduction <add>, %7, %cst_2 [1] : vector<16x32xf32> to vector<16xf32>
    %9 = vector.shape_cast %8 : vector<16xf32> to vector<16x1xf32>
    %cst_3 = arith.constant 3.100000e+01 : f32
    %10 = vector.broadcast %cst_3 : f32 to vector<16x1xf32>
    %11 = arith.divf %9, %10 : vector<16x1xf32>
    %12 = math.sqrt %11 : vector<16x1xf32>
    %cst_4 = arith.constant 9.99999997E-7 : f32
    %13 = vector.broadcast %cst_4 : f32 to vector<16x1xf32>
    %14 = arith.addf %12, %13 : vector<16x1xf32>
    %15 = tpu.reciprocal %14 {approx = true} : vector<16x1xf32> -> vector<16x1xf32>
    %16 = arith.mulf %14, %15 : vector<16x1xf32>
    %cst_5 = arith.constant 2.000000e+00 : f32
    %17 = vector.broadcast %cst_5 : f32 to vector<16x1xf32>
    %18 = arith.subf %17, %16 : vector<16x1xf32>
    %19 = arith.mulf %15, %18 : vector<16x1xf32>
    %c0_6 = arith.constant 0 : index
    %c0_7 = arith.constant 0 : index
    %20 = vector.load %arg2[%c0_6, %c0_7] : memref<1x32xf32, #tpu.memory_space<vmem>>, vector<1x32xf32>
    %c0_8 = arith.constant 0 : index
    %c0_9 = arith.constant 0 : index
    %21 = vector.load %arg3[%c0_8, %c0_9] : memref<1x32xf32, #tpu.memory_space<vmem>>, vector<1x32xf32>
    %22 = vector.broadcast %19 : vector<16x1xf32> to vector<16x32xf32>
    %23 = arith.mulf %6, %22 : vector<16x32xf32>
    %24 = vector.broadcast %20 : vector<1x32xf32> to vector<16x32xf32>
    %25 = arith.mulf %23, %24 : vector<16x32xf32>
    %26 = vector.broadcast %21 : vector<1x32xf32> to vector<16x32xf32>
    %27 = arith.addf %25, %26 : vector<16x32xf32>
    %c0_10 = arith.constant 0 : index
    %c0_11 = arith.constant 0 : index
    %28 = vector.load %arg4[%c0_10, %c0_11] : memref<16x32xf32, #tpu.memory_space<vmem>>, vector<16x32xf32>
    tpu.vector_store %arg4[%c0_10, %c0_11], %27 {strides = array<i32>} : memref<16x32xf32, #tpu.memory_space<vmem>>, vector<16x32xf32>,
    return
  }
  func.func @transform_0(%arg0: i32) -> (i32, i32) {
    %c0_i32 = arith.constant 0 : i32
    %c0_i32_0 = arith.constant 0 : i32
    return %arg0, %c0_i32 : i32, i32
  }
  func.func @transform_1(%arg0: i32) -> (i32, i32) {
    %c0_i32 = arith.constant 0 : i32
    %c0_i32_0 = arith.constant 0 : i32
    %c0_i32_1 = arith.constant 0 : i32
    return %c0_i32, %c0_i32_0 : i32, i32
  }
  func.func @transform_2(%arg0: i32) -> (i32, i32) {
    %c0_i32 = arith.constant 0 : i32
    %c0_i32_0 = arith.constant 0 : i32
    %c0_i32_1 = arith.constant 0 : i32
    return %c0_i32, %c0_i32_0 : i32, i32
  }
  func.func @transform_3(%arg0: i32) -> (i32, i32) {
    %c0_i32 = arith.constant 0 : i32
    %c0_i32_0 = arith.constant 0 : i32
    return %arg0, %c0_i32 : i32, i32
  }
}

</mosaic_0001>

<bundles_post_ra>
// kernel: tpu_custom_call.1
= control target key start
LH: loop header
LB: loop body
LE: loop exit
PB: predicated region body
PF: predicated region fallthrough
CT: control target
= control target key end

     0   :  { %8 = vsyncpa [#allocation3], 0  ;;  %s245_s0 = inlined_call_operand.hbm [shape: f32[16,32], index: 0, kind: input, shape index: {}]   ;;  %s246_s1 = inlined_call_operand.vmem [shape: f32[1,32], index: 1, kind: input, shape index: {}]   ;;  %s247_s2 = inlined_call_operand.vmem [shape: f32[1,32], index: 2, kind: input, shape index: {}]   ;;  %s248_s3 = inlined_call_operand.hbm [shape: f32[16,32], index: 3, kind: output, shape index: {}]  }
   0x1   :  { %9 = vsyncpa [#allocation4], 0  ;;  %s179_s12 = smov [#allocation2]   ;;  %s131_s16 = scalar_lea.hbm %s245_s0, 256 }
   0x2   :  { %s15_s13 = sshll.u32 %s179_s12, 4  ;;  %p132_p0 = scmp.ne.s32.totalorder %s245_s0, %s131_s16  ;;  %s16_s13 = int_to_ptr.vmem [resolvable:$true] %s15_s13 }
   0x3   :  { %p135_p1 = scmp.lt.u32.totalorder %s131_s16, %s245_s0 }
   0x5   :  { %p137_p2 = pnand %p135_p1, %p132_p0 }
   0x7   :  { %140 = shalt.err (!%p137_p2)
}
   0x8   :  { %s141_s21 = scalar_lea.vmem %s16_s13, 256  ;;  %p146_p4 = scmp.lt.s32.totalorder %s16_s13, %s16_s13 }
   0x9   :  { %p142_p3 = scmp.ne.s32.totalorder %s16_s13, %s141_s21  ;;  %p147_p5 = scmp.lt.s32.totalorder %s141_s21, %s141_s21 }
   0xb   :  { %p148_p6 = por %p147_p5, %p146_p4 }
   0xd   :  { %p149_p7 = pnand %p148_p6, %p142_p3 }
   0xf   :  { %152 = shalt.err (!%p149_p7)
}
  0x10   :  { %s180_s22 = smov 128   ;;  %s181_s23 = smov 8  }
  0x11   :  { %21 = dma.hbm_to_vmem [thread:$0]  %s245_s0, 256, %s16_s13, [#allocation3], %s180_s22, %s180_s22, %s181_s23  }
  0x12   :  { %175 = dma.done.wait [#allocation3], 256  }
  0x13   :  { %176 = vsyncadd [#allocation3], 4294967040  ;;  %vm31_vm0 = vcmask 261120   ;;  %v29_v0 = vld [vmem:[#allocation2] sm:$0xff]  ;;  %v30_v1 = vld [vmem:[#allocation2 + $0x8] sm:$0xff]  ;;  %s182_s29 = smov [#allocation5]  }
  0x14   :  { %v32_v2 = vsel %vm31_vm0, %v29_v0, 0.0  ;;  %v35_v3 = vsel %vm31_vm0, %v30_v1, 0.0  ;;  %v117_v36 = vld [vmem:[%s246_s1] ss:$0 sm:$0xff]  ;;  %s105_s30 = sshll.u32 %s182_s29, 4  ;;  %s106_s30 = int_to_ptr.vmem [resolvable:$true] %s105_s30 }
  0x15   :  { %33 = vadd.xlane.f32.xlu0 %v32_v2  ;;  %v118_v39 = vld [vmem:[%s247_s2] ss:$0 sm:$0xff]  ;;  %s153_s1 = scalar_lea.vmem %s106_s30, 256  ;;  %p158_p9 = scmp.lt.s32.totalorder %s106_s30, %s106_s30 }
  0x16   :  { %p154_p8 = scmp.ne.s32.totalorder %s106_s30, %s153_s1  ;;  %p159_p10 = scmp.lt.s32.totalorder %s153_s1, %s153_s1 }
  0x18   :  { %p160_p11 = por %p159_p10, %p158_p9 }
  0x19   :  { %36 = vadd.xlane.f32.xlu0 %v35_v3 }
  0x1a   :  { %p161_p12 = pnand %p160_p11, %p154_p8 }
  0xa2   :  { %v34_v4 = vpop.xlane.xlu0 %33 }
  0xa3   :  { %v39_v5 = vmul.f32 0.03125, %v34_v4 }
  0xa5   :  { %v41_v6 = vsub.f32 %v29_v0, %v39_v5 }
  0xa6   :  { %v37_v7 = vpop.xlane.xlu0 %36 }
  0xa7   :  { %v40_v8 = vmul.f32 0.03125, %v37_v7  ;;  %v43_v9 = vmul.f32 %v41_v6, %v41_v6 }
  0xa9   :  { %v42_v10 = vsub.f32 %v30_v1, %v40_v8  ;;  %v45_v11 = vsel %vm31_vm0, %v43_v9, 0.0 }
  0xaa   :  { %46 = vadd.xlane.f32.xlu1 %v45_v11 }
  0xab   :  { %v44_v12 = vmul.f32 %v42_v10, %v42_v10 }
  0xad   :  { %v48_v13 = vsel %vm31_vm0, %v44_v12, 0.0 }
  0xae   :  { %49 = vadd.xlane.f32.xlu1 %v48_v13 }
 0x137   :  { %v47_v14 = vpop.xlane.xlu1 %46 }
 0x138   :  { %v52_v15 = vmul.f32 0.032258064, %v47_v14 }
 0x13a   :  { %123 = vrsqrt.f32 %v52_v15  ;;  %vm56_vm1 = vcmp.eq.f32.partialorder %v52_v15, inf  ;;  %v59_v20 = vand.u32 2147483648, %v52_v15  ;;  %vm58_vm2 = vcmp.eq.f32.partialorder %v52_v15, 0.0 }
 0x13b   :  { %v50_v16 = vpop.xlane.xlu1 %49 }
 0x13c   :  { %v53_v17 = vmul.f32 0.032258064, %v50_v16 }
 0x13e   :  { %125 = vrsqrt.f32 %v53_v17  ;;  %vm63_vm3 = vcmp.eq.f32.partialorder %v53_v17, inf  ;;  %v66_v26 = vand.u32 2147483648, %v53_v17  ;;  %vm65_vm4 = vcmp.eq.f32.partialorder %v53_v17, 0.0 }
 0x144   :  { %v124_v18 = vpop.eup %123 }
 0x145   :  { %v55_v19 = vmul.f32 %v124_v18, %v52_v15 }
 0x147   :  { %v57_v21 = vsel %vm56_vm1, %v52_v15, %v55_v19 }
 0x148   :  { %v126_v22 = vpop.eup %125  ;;  %v60_v23 = vsel %vm58_vm2, %v59_v20, %v57_v21 }
 0x149   :  { %v62_v24 = vmul.f32 %v126_v22, %v53_v17  ;;  %v68_v25 = vadd.f32 1e-06, %v60_v23 }
 0x14b   :  { %v64_v27 = vsel %vm63_vm3, %v53_v17, %v62_v24  ;;  %127 = vrcp.f32 %v68_v25 }
 0x14c   :  { %v67_v28 = vsel %vm65_vm4, %v66_v26, %v64_v27 }
 0x14d   :  { %v69_v29 = vadd.f32 1e-06, %v67_v28 }
 0x14f   :  { %129 = vrcp.f32 %v69_v29 }
 0x155   :  { %v128_v30 = vpop.eup %127 }
 0x156   :  { %v72_v31 = vmul.f32 %v128_v30, %v68_v25 }
 0x158   :  { %v74_v32 = vsub.f32 2.0, %v72_v31 }
 0x159   :  { %v130_v33 = vpop.eup %129 }
 0x15a   :  { %v73_v34 = vmul.f32 %v130_v33, %v69_v29  ;;  %v76_v35 = vmul.f32 %v128_v30, %v74_v32 }
 0x15c   :  { %v75_v37 = vsub.f32 2.0, %v73_v34  ;;  %v80_v38 = vmul.f32 %v76_v35, %v41_v6 }
 0x15e   :  { %v77_v40 = vmul.f32 %v130_v33, %v75_v37  ;;  %v88_v41 = vmul.f32 %v117_v36, %v80_v38 }
 0x160   :  { %v81_v42 = vmul.f32 %v77_v40, %v42_v10  ;;  %v96_v43 = vadd.f32 %v118_v39, %v88_v41 }
 0x162   :  { %v89_v44 = vmul.f32 %v117_v36, %v81_v42  ;;  %98 = vst.msk [vmem:[#allocation5] sm:$0xff] %vm31_vm0, %v96_v43 }
 0x164   :  { %v97_v45 = vadd.f32 %v118_v39, %v89_v44 }
 0x166   :  { %99 = vst.msk [vmem:[#allocation5 + $0x8] sm:$0xff] %vm31_vm0, %v97_v45 }
 0x167   :  { %164 = shalt.err (!%p161_p12)
}
 0x168   :  { %s165_s5 = scalar_lea.hbm %s248_s3, 256 }
 0x169   :  { %p166_p13 = scmp.ne.s32.totalorder %s248_s3, %s165_s5  ;;  %p169_p0 = scmp.lt.u32.totalorder %s165_s5, %s248_s3 }
 0x16b   :  { %p171_p1 = pnand %p169_p0, %p166_p13 }
 0x16d   :  { %174 = shalt.err (!%p171_p1)
}
 0x16e   :  { %111 = dma.vmem_to_hbm [thread:$0]  %s106_s30, 256, %s248_s3, [#allocation4], %s180_s22, %s180_s22, %s181_s23  }
 0x16f   :  { %177 = dma.done.wait [#allocation4], 256  }
 0x170   :  { %178 = vsyncadd [#allocation4], 4294967040 }
 0x171   :  { %115 = vsyncpa [#allocation3], 1 }
 0x172   :  { %116 = vsyncpa [#allocation4], 1 }

</bundles_post_ra>
